<compile_context>
chip_gen: v7x
topology: tpu7x:2x2x1
jax: 0.10.0
libtpu: 0.0.40
codegen_flags: <defaults>
</compile_context>

<pallas_src>
import functools
import math

import jax
import jax.numpy as jnp
from jax import lax
from jax.experimental import pallas as pl
from jax.experimental.pallas import tpu as pltpu


def _round_up(n, m):
    return ((n + m - 1) // m) * m


def _pad_to(a, size, axis):
    pad = size - a.shape[axis]
    if pad == 0:
        return a
    widths = [(0, 0)] * a.ndim
    widths[axis] = (0, pad)
    return jnp.pad(a, widths)


def value_net_kernel(x_ref, w1_ref, b1_ref, w2_ref, b2_ref, w3_ref, b3_ref,
                     o_ref):
    """One batch tile of the fused 3-layer MLP value head."""
    x = x_ref[...]                                               # (TILE_B, D)

    # fc1 + ReLU (MXU matmul, f32 accumulate; lane-dense 128-wide hidden)
    h1 = jnp.dot(x, w1_ref[...], preferred_element_type=jnp.float32)
    h1 = jnp.maximum(h1 + b1_ref[...], 0.0)                      # (TILE_B, HP)

    # fc2 + ReLU
    h2 = jnp.dot(h1, w2_ref[...], preferred_element_type=jnp.float32)
    h2 = jnp.maximum(h2 + b2_ref[...], 0.0)                      # (TILE_B, HP)

    # fc3 (value head): contract the hidden dim of the single weight row with
    # the hidden dim of h2 -> a lane-dense (1, TILE_B) row.  Avoids an N=1
    # MXU pass and a lane-sparse [TILE_B, 1] store.
    row = lax.dot_general(
        w3_ref[...], h2,
        dimension_numbers=(((1,), (1,)), ((), ())),
        preferred_element_type=jnp.float32)                      # (1, TILE_B)

    o_ref[...] = (row + b3_ref[0, 0]).astype(o_ref.dtype)


@functools.partial(jax.jit, static_argnames=("tile_b",))
def value_network_forward(x, params, tile_b=512):
    """x: [B, input_dim] float32 -> [B, 1] float32 (== PyTorch ValueNetwork)."""
    w1, b1, w2, b2, w3, b3 = params
    B, D = x.shape
    H = w1.shape[1]                       # logical hidden width (64)
    HP = _round_up(H, 128)                # lane-dense hidden width (128)

    # ---- wrapper-side zero padding (exact; see header) --------------------
    w1p = _pad_to(w1, HP, axis=1)                        # (D, HP)
    b1p = _pad_to(b1, HP, axis=1)                        # (1, HP)
    w2p = _pad_to(_pad_to(w2, HP, axis=0), HP, axis=1)   # (HP, HP)
    b2p = _pad_to(b2, HP, axis=1)                        # (1, HP)
    w3p = _pad_to(w3.reshape(1, H), HP, axis=1)          # (1, HP) row vector
    b3s = b3.reshape(1, 1)                               # scalar -> SMEM

    # ---- batch tiling: multiple of 128 keeps the output row lane-dense and
    #      the MXU well fed; shrink the tile for small batches. --------------
    tile_b = max(128, min(_round_up(tile_b, 128), _round_up(B, 128)))
    b_pad = _round_up(B, tile_b)
    if b_pad != B:
        x = jnp.pad(x, ((0, b_pad - B), (0, 0)))
    num_tiles = b_pad // tile_b

    flops = 2 * b_pad * (D * HP + HP * HP + HP)
    bytes_accessed = 4 * (b_pad * D + b_pad + D * HP + HP * HP + 3 * HP + 1)

    resident = lambda shape: pl.BlockSpec(shape, lambda i: (0, 0))

    out_row = pl.pallas_call(
        value_net_kernel,
        out_shape=jax.ShapeDtypeStruct((1, b_pad), jnp.float32),
        grid=(num_tiles,),
        in_specs=[
            pl.BlockSpec((tile_b, D), lambda i: (i, 0)),         # x (streamed)
            resident((D, HP)),                                   # w1 (resident)
            resident((1, HP)),                                   # b1
            resident((HP, HP)),                                  # w2
            resident((1, HP)),                                   # b2
            resident((1, HP)),                                   # w3 row
            pl.BlockSpec(memory_space=pltpu.MemorySpace.SMEM),   # b3 scalar
        ],
        out_specs=pl.BlockSpec((1, tile_b), lambda i: (0, i)),   # lane-dense
        compiler_params=pltpu.CompilerParams(
            dimension_semantics=("parallel",)),
        cost_estimate=pl.CostEstimate(
            flops=flops, transcendentals=0, bytes_accessed=bytes_accessed),
    )(x, w1p, b1p, w2p, b2p, w3p, b3s)

    # Layout plumbing only: lane-dense row back to the PyTorch [B, 1] shape.
    return out_row[0, :B].reshape(B, 1)


def init_params(key, input_dim, hidden=64):
    """Deterministic init mimicking PyTorch nn.Linear defaults
    (uniform in [-1/sqrt(fan_in), 1/sqrt(fan_in)]); W stored as [in, out]."""
    keys = jax.random.split(key, 6)

    def linear_init(kw, kb, fan_in, fan_out):
        bound = 1.0 / math.sqrt(fan_in)
        w = jax.random.uniform(kw, (fan_in, fan_out), jnp.float32,
                               minval=-bound, maxval=bound)
        b = jax.random.uniform(kb, (1, fan_out), jnp.float32,
                               minval=-bound, maxval=bound)
        return w, b

    w1, b1 = linear_init(keys[0], keys[1], input_dim, hidden)
    w2, b2 = linear_init(keys[2], keys[3], hidden, hidden)
    w3, b3 = linear_init(keys[4], keys[5], hidden, 1)
    return (w1, b1, w2, b2, w3, b3)


def reference_forward(x, params):
    """Plain-JAX reference of the same forward pass."""
    w1, b1, w2, b2, w3, b3 = params
    h1 = jnp.maximum(x @ w1 + b1, 0.0)
    h2 = jnp.maximum(h1 @ w2 + b2, 0.0)
    return h2 @ w3 + b3


if __name__ == "__main__":
    key = jax.random.PRNGKey(0)
    k_params, k_x = jax.random.split(key)

    batch, input_dim = 8, 32
    params = init_params(k_params, input_dim)
    x = jax.random.normal(k_x, (batch, input_dim), dtype=jnp.float32)

    out = value_network_forward(x, params)
    out = jax.block_until_ready(out)

    ref = reference_forward(x, params)
    assert out.shape == (batch, 1), out.shape
    err = jnp.max(jnp.abs(out - ref))
    assert jnp.allclose(out, ref, atol=1e-4, rtol=1e-4), f"max abs err {err}"

    print("KERNEL_OK")
</pallas_src>

<mosaic_0001>
module attributes {stable_mosaic.version = 11 : i64} {
  func.func @value_net_kernel(%arg0: i32, %arg1: memref<128x32xf32, #tpu.memory_space<vmem>>, %arg2: memref<32x128xf32, #tpu.memory_space<vmem>>, %arg3: memref<1x128xf32, #tpu.memory_space<vmem>>, %arg4: memref<128x128xf32, #tpu.memory_space<vmem>>, %arg5: memref<1x128xf32, #tpu.memory_space<vmem>>, %arg6: memref<1x128xf32, #tpu.memory_space<vmem>>, %arg7: memref<1x1xf32, #tpu.memory_space<smem>>, %arg8: memref<1x128xf32, #tpu.memory_space<vmem>>) attributes {dimension_semantics = [#tpu.dimension_semantics<parallel>], iteration_bounds = array<i64: 1>, scalar_prefetch = 0 : i64, scratch_operands = 0 : i64, tpu.core_type = #tpu.core_type<tc>, window_params = [{transform_indices = @transform_0, window_bounds = array<i64: 128, 32>}, {pipeline_mode = #tpu.pipeline_mode<synchronous>, transform_indices = @transform_1, window_bounds = array<i64: 32, 128>}, {pipeline_mode = #tpu.pipeline_mode<synchronous>, transform_indices = @transform_2, window_bounds = array<i64: 1, 128>}, {pipeline_mode = #tpu.pipeline_mode<synchronous>, transform_indices = @transform_3, window_bounds = array<i64: 128, 128>}, {pipeline_mode = #tpu.pipeline_mode<synchronous>, transform_indices = @transform_4, window_bounds = array<i64: 1, 128>}, {pipeline_mode = #tpu.pipeline_mode<synchronous>, transform_indices = @transform_5, window_bounds = array<i64: 1, 128>}, {transform_indices = @transform_6, window_bounds = array<i64: 1, 1>}, {transform_indices = @transform_7, window_bounds = array<i64: 1, 128>}]} {
    %c0 = arith.constant 0 : index
    %c0_0 = arith.constant 0 : index
    %0 = vector.load %arg1[%c0, %c0_0] : memref<128x32xf32, #tpu.memory_space<vmem>>, vector<128x32xf32>
    %c0_1 = arith.constant 0 : index
    %c0_2 = arith.constant 0 : index
    %1 = vector.load %arg2[%c0_1, %c0_2] : memref<32x128xf32, #tpu.memory_space<vmem>>, vector<32x128xf32>
    %cst = arith.constant dense<0.000000e+00> : vector<128x128xf32>
    %2 = tpu.matmul %0, %1, %cst {dimension_numbers = #tpu.dot_dimension_numbers<[1], [0], [0], [1], [0, 0, 1, 1], [], []>} : vector<128x32xf32>, vector<32x128xf32>, vector<128x128xf32> -> vector<128x128xf32>
    %c0_3 = arith.constant 0 : index
    %c0_4 = arith.constant 0 : index
    %3 = vector.load %arg3[%c0_3, %c0_4] : memref<1x128xf32, #tpu.memory_space<vmem>>, vector<1x128xf32>
    %4 = vector.broadcast %3 : vector<1x128xf32> to vector<128x128xf32>
    %5 = arith.addf %2, %4 : vector<128x128xf32>
    %cst_5 = arith.constant 0.000000e+00 : f32
    %6 = vector.broadcast %cst_5 : f32 to vector<128x128xf32>
    %7 = arith.maximumf %5, %6 : vector<128x128xf32>
    %c0_6 = arith.constant 0 : index
    %c0_7 = arith.constant 0 : index
    %8 = vector.load %arg4[%c0_6, %c0_7] : memref<128x128xf32, #tpu.memory_space<vmem>>, vector<128x128xf32>
    %cst_8 = arith.constant dense<0.000000e+00> : vector<128x128xf32>
    %9 = tpu.matmul %7, %8, %cst_8 {dimension_numbers = #tpu.dot_dimension_numbers<[1], [0], [0], [1], [0, 0, 1, 1], [], []>} : vector<128x128xf32>, vector<128x128xf32>, vector<128x128xf32> -> vector<128x128xf32>
    %c0_9 = arith.constant 0 : index
    %c0_10 = arith.constant 0 : index
    %10 = vector.load %arg5[%c0_9, %c0_10] : memref<1x128xf32, #tpu.memory_space<vmem>>, vector<1x128xf32>
    %11 = vector.broadcast %10 : vector<1x128xf32> to vector<128x128xf32>
    %12 = arith.addf %9, %11 : vector<128x128xf32>
    %cst_11 = arith.constant 0.000000e+00 : f32
    %13 = vector.broadcast %cst_11 : f32 to vector<128x128xf32>
    %14 = arith.maximumf %12, %13 : vector<128x128xf32>
    %c0_12 = arith.constant 0 : index
    %c0_13 = arith.constant 0 : index
    %15 = vector.load %arg6[%c0_12, %c0_13] : memref<1x128xf32, #tpu.memory_space<vmem>>, vector<1x128xf32>
    %cst_14 = arith.constant dense<0.000000e+00> : vector<1x128xf32>
    %16 = tpu.matmul %15, %14, %cst_14 {dimension_numbers = #tpu.dot_dimension_numbers<[1], [1], [0], [0], [0, 0, 1, 0], [], []>} : vector<1x128xf32>, vector<128x128xf32>, vector<1x128xf32> -> vector<1x128xf32>
    %c0_15 = arith.constant 0 : index
    %c0_16 = arith.constant 0 : index
    %17 = memref.load %arg7[%c0_15, %c0_16] : memref<1x1xf32, #tpu.memory_space<smem>>
    %18 = vector.broadcast %17 : f32 to vector<1x128xf32>
    %19 = arith.addf %16, %18 : vector<1x128xf32>
    %c0_17 = arith.constant 0 : index
    %c0_18 = arith.constant 0 : index
    %20 = vector.load %arg8[%c0_17, %c0_18] : memref<1x128xf32, #tpu.memory_space<vmem>>, vector<1x128xf32>
    tpu.vector_store %arg8[%c0_17, %c0_18], %19 {strides = array<i32>} : memref<1x128xf32, #tpu.memory_space<vmem>>, vector<1x128xf32>,
    return
  }
  func.func @transform_0(%arg0: i32) -> (i32, i32) {
    %c0_i32 = arith.constant 0 : i32
    %c0_i32_0 = arith.constant 0 : i32
    return %arg0, %c0_i32 : i32, i32
  }
  func.func @transform_1(%arg0: i32) -> (i32, i32) {
    %c0_i32 = arith.constant 0 : i32
    %c0_i32_0 = arith.constant 0 : i32
    %c0_i32_1 = arith.constant 0 : i32
    return %c0_i32, %c0_i32_0 : i32, i32
  }
  func.func @transform_2(%arg0: i32) -> (i32, i32) {
    %c0_i32 = arith.constant 0 : i32
    %c0_i32_0 = arith.constant 0 : i32
    %c0_i32_1 = arith.constant 0 : i32
    return %c0_i32, %c0_i32_0 : i32, i32
  }
  func.func @transform_3(%arg0: i32) -> (i32, i32) {
    %c0_i32 = arith.constant 0 : i32
    %c0_i32_0 = arith.constant 0 : i32
    %c0_i32_1 = arith.constant 0 : i32
    return %c0_i32, %c0_i32_0 : i32, i32
  }
  func.func @transform_4(%arg0: i32) -> (i32, i32) {
    %c0_i32 = arith.constant 0 : i32
    %c0_i32_0 = arith.constant 0 : i32
    %c0_i32_1 = arith.constant 0 : i32
    return %c0_i32, %c0_i32_0 : i32, i32
  }
  func.func @transform_5(%arg0: i32) -> (i32, i32) {
    %c0_i32 = arith.constant 0 : i32
    %c0_i32_0 = arith.constant 0 : i32
    %c0_i32_1 = arith.constant 0 : i32
    return %c0_i32, %c0_i32_0 : i32, i32
  }
  func.func @transform_6(%arg0: i32) -> (i32, i32) {
    %c0_i32 = arith.constant 0 : i32
    %c0_i32_0 = arith.constant 0 : i32
    %c0_i32_1 = arith.constant 0 : i32
    return %c0_i32, %c0_i32_0 : i32, i32
  }
  func.func @transform_7(%arg0: i32) -> (i32, i32) {
    %c0_i32 = arith.constant 0 : i32
    %c0_i32_0 = arith.constant 0 : i32
    return %c0_i32, %arg0 : i32, i32
  }
}

</mosaic_0001>

<bundles_post_ra>
// kernel: value_network_forward.1
= control target key start
LH: loop header
LB: loop body
LE: loop exit
PB: predicated region body
PF: predicated region fallthrough
CT: control target
= control target key end

     0   :  { %vm54_vm0 = vcmask 261120   ;;  %vm804_vm1 = vmmov 0   ;;  %s993_s1 = inlined_call_operand.vmem [shape: f32[32,128], index: 1, kind: input, shape index: {}]   ;;  %s994_s0 = inlined_call_operand.vmem [shape: f32[128,32], index: 0, kind: input, shape index: {}]   ;;  %s995_s3 = inlined_call_operand.vmem [shape: f32[128,128], index: 3, kind: input, shape index: {}]   ;;  %s996_s2 = inlined_call_operand.vmem [shape: f32[1,128], index: 2, kind: input, shape index: {}]   ;;  %s997_s4 = inlined_call_operand.vmem [shape: f32[1,128], index: 4, kind: input, shape index: {}]   ;;  %s998_s5 = inlined_call_operand.vmem [shape: f32[1,128], index: 5, kind: input, shape index: {}]   ;;  %s999_s6 = inlined_call_operand.<no memory space> [shape: f32[1,1], index: 6, kind: input, shape index: {}]   ;;  %s1000_s7 = inlined_call_operand.vmem [shape: f32[1,128], index: 7, kind: output, shape index: {}]  }
   0x1   :  { %v43_v0 = vld [vmem:[%s993_s1] sm:$0xff]  ;;  %v44_v1 = vld [vmem:[%s993_s1 + $0x8] sm:$0xff]  ;;  %v45_v2 = vld [vmem:[%s993_s1 + $0x10] sm:$0xff] }
   0x2   :  { %v736_v3 = vpack.c.bf16 %v44_v1, %v43_v0  ;;  %v46_v4 = vld [vmem:[%s993_s1 + $0x18] sm:$0xff]  ;;  %v27_v5 = vld [vmem:[%s994_s0] sm:$0xff]  ;;  %v265_v8 = vld [vmem:[%s995_s3 + $0x8] sm:$0xff] }
   0x3   :  { %v740_v6 = vpack.c.bf16 %v46_v4, %v45_v2  ;;  %621 = vmatprep.mubr.msk.f32.mxu1 %vm54_vm0, %v27_v5  ;;  %v264_v7 = vld [vmem:[%s995_s3] sm:$0xff]  ;;  %v266_v9 = vld [vmem:[%s995_s3 + $0x10] sm:$0xff]  ;;  %v267_v10 = vld [vmem:[%s995_s3 + $0x18] sm:$0xff] }
   0x4   :  { %737 = vmatprep.subr.bf16.mxu1 %v736_v3  ;;  %v28_v11 = vld [vmem:[%s994_s0 + $0x8] sm:$0xff]  ;;  %v744_v12 = vpack.c.bf16 %v265_v8, %v264_v7  ;;  %v29_v13 = vld [vmem:[%s994_s0 + $0x10] sm:$0xff]  ;;  %v748_v14 = vpack.c.bf16 %v267_v10, %v266_v9  ;;  %v268_v15 = vld [vmem:[%s995_s3 + $0x20] sm:$0xff] }
   0x5   :  { %739 = vmatpush3.bf16.msra.mxu1 %v736_v3  ;;  %v269_v16 = vld [vmem:[%s995_s3 + $0x28] sm:$0xff]  ;;  %v30_v17 = vld [vmem:[%s994_s0 + $0x18] sm:$0xff]  ;;  %v31_v18 = vld [vmem:[%s994_s0 + $0x20] sm:$0xff] }
   0x6   :  { %741 = vmatprep.subr.bf16.mxu1 %v740_v6  ;;  %v752_v19 = vpack.c.bf16 %v269_v16, %v268_v15  ;;  %v270_v20 = vld [vmem:[%s995_s3 + $0x30] sm:$0xff]  ;;  %v271_v21 = vld [vmem:[%s995_s3 + $0x38] sm:$0xff]  ;;  %v32_v22 = vld [vmem:[%s994_s0 + $0x28] sm:$0xff] }
   0x7   :  { %v33_v23 = vld [vmem:[%s994_s0 + $0x30] sm:$0xff]  ;;  %v756_v24 = vpack.c.bf16 %v271_v21, %v270_v20  ;;  %v272_v25 = vld [vmem:[%s995_s3 + $0x40] sm:$0xff]  ;;  %v273_v26 = vld [vmem:[%s995_s3 + $0x48] sm:$0xff] }
   0x8   :  { %v34_v27 = vld [vmem:[%s994_s0 + $0x38] sm:$0xff]  ;;  %v35_v28 = vld [vmem:[%s994_s0 + $0x40] sm:$0xff]  ;;  %v760_v29 = vpack.c.bf16 %v273_v26, %v272_v25  ;;  %v274_v30 = vld [vmem:[%s995_s3 + $0x50] sm:$0xff] }
   0x9   :  { %743 = vmatpush3.bf16.msra.mxu1 %v740_v6  ;;  %v275_v31 = vld [vmem:[%s995_s3 + $0x58] sm:$0xff]  ;;  %v36_v32 = vld [vmem:[%s994_s0 + $0x48] sm:$0xff]  ;;  %v37_v33 = vld [vmem:[%s994_s0 + $0x50] sm:$0xff] }
   0xa   :  { %745 = vmatprep.subr.bf16.mxu1 %v744_v12  ;;  %v764_v34 = vpack.c.bf16 %v275_v31, %v274_v30  ;;  %v276_v35 = vld [vmem:[%s995_s3 + $0x60] sm:$0xff]  ;;  %v277_v36 = vld [vmem:[%s995_s3 + $0x68] sm:$0xff]  ;;  %v38_v37 = vld [vmem:[%s994_s0 + $0x58] sm:$0xff]  ;;  %v803_v31 = vmov 0.0|0.0  }
   0xb   :  { %v39_v38 = vld [vmem:[%s994_s0 + $0x60] sm:$0xff]  ;;  %v768_v39 = vpack.c.bf16 %v277_v36, %v276_v35  ;;  %v40_v40 = vld [vmem:[%s994_s0 + $0x68] sm:$0xff]  ;;  %v41_v41 = vld [vmem:[%s994_s0 + $0x70] sm:$0xff]  ;;  %776 = vmatprep.subr.bf16.mxu0 %v803_v31 }
   0xc   :  { %622 = vmatmul.mubr.msk.f32.vlgmr.msra.gmra.mrb[0].mxu1 %vm54_vm0, %v28_v11  ;;  %v42_v42 = vld [vmem:[%s994_s0 + $0x78] sm:$0xff]  ;;  %v278_v43 = vld [vmem:[%s995_s3 + $0x70] sm:$0xff]  ;;  %v526_v46 = vld [vmem:[%s996_s2] ss:$0 sm:$0xff] }
   0xd   :  { %624 = vmatprep.mubr.msk.f32.mxu1 %vm54_vm0, %v29_v13  ;;  %747 = vmatpush3.bf16.msra.mxu1 %v744_v12  ;;  %v279_v44 = vld [vmem:[%s995_s3 + $0x78] sm:$0xff] }
   0xe   :  { %749 = vmatprep.subr.bf16.mxu1 %v748_v14  ;;  %v772_v45 = vpack.c.bf16 %v279_v44, %v278_v43 }
  0x10   :  { %625 = vmatmul.mubr.msk.f32.gmra.mrb[2].mxu1 %vm54_vm0, %v30_v17 }
  0x11   :  { %627 = vmatprep.mubr.msk.f32.mxu1 %vm54_vm0, %v31_v18  ;;  %751 = vmatpush3.bf16.msra.mxu1 %v748_v14 }
  0x12   :  { %753 = vmatprep.subr.bf16.mxu1 %v752_v19 }
  0x14   :  { %628 = vmatmul.mubr.msk.f32.gmra.mrb[4].mxu1 %vm54_vm0, %v32_v22 }
  0x15   :  { %630 = vmatprep.mubr.msk.f32.mxu1 %vm54_vm0, %v33_v23  ;;  %755 = vmatpush3.bf16.msra.mxu1 %v752_v19 }
  0x16   :  { %757 = vmatprep.subr.bf16.mxu1 %v756_v24 }
  0x18   :  { %631 = vmatmul.mubr.msk.f32.gmra.mrb[6].mxu1 %vm54_vm0, %v34_v27 }
  0x19   :  { %633 = vmatprep.mubr.msk.f32.mxu1 %vm54_vm0, %v35_v28  ;;  %759 = vmatpush3.bf16.msra.mxu1 %v756_v24 }
  0x1a   :  { %761 = vmatprep.subr.bf16.mxu1 %v760_v29 }
  0x1c   :  { %634 = vmatmul.mubr.msk.f32.gmra.mrb[8].mxu1 %vm54_vm0, %v36_v32  ;;  %v805_v32 = vmov 0.0  }
  0x1d   :  { %636 = vmatprep.mubr.msk.f32.mxu1 %vm54_vm0, %v37_v33  ;;  %763 = vmatpush3.bf16.msra.mxu1 %v760_v29  ;;  %v543_v33 = vld [vmem:[%s997_s4] ss:$0 sm:$0xff] }
  0x1e   :  { %765 = vmatprep.subr.bf16.mxu1 %v764_v34  ;;  %733 = vmatprep.mubr.msk.f32.mxu0 %vm804_vm1, %v805_v32 }
  0x20   :  { %637 = vmatmul.mubr.msk.f32.gmra.mrb[10].mxu1 %vm54_vm0, %v38_v37 }
  0x21   :  { %639 = vmatprep.mubr.msk.f32.mxu1 %vm54_vm0, %v39_v38  ;;  %767 = vmatpush3.bf16.msra.mxu1 %v764_v34 }
  0x22   :  { %769 = vmatprep.subr.bf16.mxu1 %v768_v39 }
  0x24   :  { %640 = vmatmul.mubr.msk.f32.gmra.mrb[12].mxu1 %vm54_vm0, %v40_v40 }
  0x25   :  { %642 = vmatprep.mubr.msk.f32.mxu1 %vm54_vm0, %v41_v41  ;;  %771 = vmatpush3.bf16.msra.mxu1 %v768_v39 }
  0x26   :  { %773 = vmatprep.subr.bf16.mxu1 %v772_v45 }
  0x28   :  { %643 = vmatmul.mubr.msk.f32.gmra.mrb[14].mxu1 %vm54_vm0, %v42_v42 }
  0x29   :  { %775 = vmatpush3.bf16.msra.mxu1 %v772_v45 }
  0xdf   :  { %v623_v47 = vpop.f32.mrb[0].mxu1 }
  0xe0   :  { %v175_v48 = vadd.f32 %v623_v47, %v526_v46  ;;  %v169_v49 = vpop.f32.mrb[1].mxu1 }
  0xe1   :  { %v170_v50 = vadd.f32 %v526_v46, %v169_v49 }
  0xe2   :  { %v249_v53 = vmax.f32 %v175_v48, 0.0 }
  0xe3   :  { %v248_v51 = vmax.f32 %v170_v50, 0.0  ;;  %v626_v52 = vpop.f32.mrb[2].mxu1 }
  0xe4   :  { %v185_v54 = vadd.f32 %v626_v52, %v526_v46  ;;  %v179_v55 = vpop.f32.mrb[3].mxu1 }
  0xe5   :  { %v180_v56 = vadd.f32 %v526_v46, %v179_v55  ;;  %677 = vmatprep.mubr.f32.mxu1 %v248_v51 }
  0xe6   :  { %v251_v57 = vmax.f32 %v185_v54, 0.0  ;;  %678 = vmatmul.mubr.f32.vlgmr.msra.gmra.mrb[16].mxu1 %v249_v53 }
  0xe7   :  { %v250_v58 = vmax.f32 %v180_v56, 0.0  ;;  %v629_v59 = vpop.f32.mrb[4].mxu1 }
  0xe8   :  { %v195_v60 = vadd.f32 %v629_v59, %v526_v46  ;;  %v189_v61 = vpop.f32.mrb[5].mxu1 }
  0xe9   :  { %680 = vmatprep.mubr.f32.mxu1 %v250_v58  ;;  %v190_v62 = vadd.f32 %v526_v46, %v189_v61 }
  0xea   :  { %681 = vmatmul.mubr.f32.gmra.mrb[18].mxu1 %v251_v57  ;;  %v253_v63 = vmax.f32 %v195_v60, 0.0 }
  0xeb   :  { %v252_v0 = vmax.f32 %v190_v62, 0.0  ;;  %v632_v1 = vpop.f32.mrb[6].mxu1 }
  0xec   :  { %v205_v2 = vadd.f32 %v632_v1, %v526_v46  ;;  %v199_v3 = vpop.f32.mrb[7].mxu1 }
  0xed   :  { %683 = vmatprep.mubr.f32.mxu1 %v252_v0  ;;  %v200_v4 = vadd.f32 %v526_v46, %v199_v3 }
  0xee   :  { %684 = vmatmul.mubr.f32.gmra.mrb[20].mxu1 %v253_v63  ;;  %v255_v5 = vmax.f32 %v205_v2, 0.0 }
  0xef   :  { %v254_v6 = vmax.f32 %v200_v4, 0.0  ;;  %v635_v7 = vpop.f32.mrb[8].mxu1 }
  0xf0   :  { %v215_v8 = vadd.f32 %v635_v7, %v526_v46  ;;  %v209_v9 = vpop.f32.mrb[9].mxu1 }
  0xf1   :  { %686 = vmatprep.mubr.f32.mxu1 %v254_v6  ;;  %v210_v10 = vadd.f32 %v526_v46, %v209_v9 }
  0xf2   :  { %687 = vmatmul.mubr.f32.gmra.mrb[22].mxu1 %v255_v5  ;;  %v257_v11 = vmax.f32 %v215_v8, 0.0 }
  0xf3   :  { %v256_v12 = vmax.f32 %v210_v10, 0.0  ;;  %v638_v13 = vpop.f32.mrb[10].mxu1 }
  0xf4   :  { %v225_v14 = vadd.f32 %v638_v13, %v526_v46  ;;  %v219_v15 = vpop.f32.mrb[11].mxu1 }
  0xf5   :  { %689 = vmatprep.mubr.f32.mxu1 %v256_v12  ;;  %v220_v16 = vadd.f32 %v526_v46, %v219_v15 }
  0xf6   :  { %690 = vmatmul.mubr.f32.gmra.mrb[24].mxu1 %v257_v11  ;;  %v259_v17 = vmax.f32 %v225_v14, 0.0 }
  0xf7   :  { %v258_v18 = vmax.f32 %v220_v16, 0.0  ;;  %v641_v19 = vpop.f32.mrb[12].mxu1 }
  0xf8   :  { %v235_v20 = vadd.f32 %v641_v19, %v526_v46  ;;  %v229_v21 = vpop.f32.mrb[13].mxu1 }
  0xf9   :  { %692 = vmatprep.mubr.f32.mxu1 %v258_v18  ;;  %v230_v22 = vadd.f32 %v526_v46, %v229_v21 }
  0xfa   :  { %693 = vmatmul.mubr.f32.gmra.mrb[26].mxu1 %v259_v17  ;;  %v261_v23 = vmax.f32 %v235_v20, 0.0 }
  0xfb   :  { %v260_v24 = vmax.f32 %v230_v22, 0.0  ;;  %v644_v25 = vpop.f32.mrb[14].mxu1 }
  0xfc   :  { %v245_v26 = vadd.f32 %v644_v25, %v526_v46  ;;  %v239_v27 = vpop.f32.mrb[15].mxu1 }
  0xfd   :  { %695 = vmatprep.mubr.f32.mxu1 %v260_v24  ;;  %v240_v28 = vadd.f32 %v526_v46, %v239_v27  ;;  %v450_v27 = vstv %s999_s6 }
  0xfe   :  { %696 = vmatmul.mubr.f32.gmra.mrb[28].mxu1 %v261_v23  ;;  %v263_v29 = vmax.f32 %v245_v26, 0.0  ;;  %v448_v26 = vld [vmem:[%s998_s5] sm:$0x1] }
  0xff   :  { %v262_v30 = vmax.f32 %v240_v28, 0.0 }
 0x101   :  { %698 = vmatprep.mubr.f32.mxu1 %v262_v30 }
 0x102   :  { %699 = vmatmul.mubr.f32.gmra.mrb[30].mxu1 %v263_v29 }
 0x1b9   :  { %v679_v34 = vpop.f32.mrb[16].mxu1 }
 0x1ba   :  { %v359_v35 = vadd.f32 %v679_v34, %v543_v33  ;;  %v353_v36 = vpop.f32.mrb[17].mxu1 }
 0x1bb   :  { %v354_v37 = vadd.f32 %v543_v33, %v353_v36 }
 0x1bc   :  { %v433_v38 = vmax.f32 %v359_v35, 0.0 }
 0x1bd   :  { %v432_v39 = vmax.f32 %v354_v37, 0.0  ;;  %v682_v40 = vpop.f32.mrb[18].mxu1 }
 0x1be   :  { %v369_v41 = vadd.f32 %v682_v40, %v543_v33  ;;  %v363_v42 = vpop.f32.mrb[19].mxu1 }
 0x1bf   :  { %v364_v43 = vadd.f32 %v543_v33, %v363_v42  ;;  %v777_v44 = vpack.c.bf16 %v433_v38, %v432_v39 }
 0x1c0   :  { %v435_v45 = vmax.f32 %v369_v41, 0.0 }
 0x1c1   :  { %v434_v46 = vmax.f32 %v364_v43, 0.0  ;;  %778 = vmatpush3.bf16.xpose.msra.mxu0 %v777_v44  ;;  %v685_v47 = vpop.f32.mrb[20].mxu1 }
 0x1c2   :  { %v379_v48 = vadd.f32 %v685_v47, %v543_v33  ;;  %v373_v49 = vpop.f32.mrb[21].mxu1  ;;  %779 = vmatprep.subr.bf16.mxu0 %v803_v31 }
 0x1c3   :  { %v780_v50 = vpack.c.bf16 %v435_v45, %v434_v46  ;;  %v374_v51 = vadd.f32 %v543_v33, %v373_v49 }
 0x1c4   :  { %v437_v52 = vmax.f32 %v379_v48, 0.0 }
 0x1c5   :  { %v436_v53 = vmax.f32 %v374_v51, 0.0  ;;  %v688_v54 = vpop.f32.mrb[22].mxu1 }
 0x1c6   :  { %v389_v55 = vadd.f32 %v688_v54, %v543_v33  ;;  %v383_v56 = vpop.f32.mrb[23].mxu1 }
 0x1c7   :  { %v783_v57 = vpack.c.bf16 %v437_v52, %v436_v53  ;;  %v384_v58 = vadd.f32 %v543_v33, %v383_v56 }
 0x1c8   :  { %v439_v59 = vmax.f32 %v389_v55, 0.0 }
 0x1c9   :  { %781 = vmatpush3.bf16.xpose.msra.mxu0 %v780_v50  ;;  %v438_v60 = vmax.f32 %v384_v58, 0.0  ;;  %v691_v61 = vpop.f32.mrb[24].mxu1 }
 0x1ca   :  { %782 = vmatprep.subr.bf16.mxu0 %v803_v31  ;;  %v399_v62 = vadd.f32 %v691_v61, %v543_v33  ;;  %v393_v63 = vpop.f32.mrb[25].mxu1 }
 0x1cb   :  { %v786_v0 = vpack.c.bf16 %v439_v59, %v438_v60  ;;  %v394_v1 = vadd.f32 %v543_v33, %v393_v63 }
 0x1cc   :  { %v441_v2 = vmax.f32 %v399_v62, 0.0 }
 0x1cd   :  { %v440_v3 = vmax.f32 %v394_v1, 0.0  ;;  %v694_v4 = vpop.f32.mrb[26].mxu1 }
 0x1ce   :  { %v409_v5 = vadd.f32 %v694_v4, %v543_v33  ;;  %v403_v6 = vpop.f32.mrb[27].mxu1 }
 0x1cf   :  { %v789_v7 = vpack.c.bf16 %v441_v2, %v440_v3  ;;  %v404_v8 = vadd.f32 %v543_v33, %v403_v6 }
 0x1d0   :  { %v443_v9 = vmax.f32 %v409_v5, 0.0 }
 0x1d1   :  { %784 = vmatpush3.bf16.xpose.msra.mxu0 %v783_v57  ;;  %v442_v10 = vmax.f32 %v404_v8, 0.0  ;;  %v697_v11 = vpop.f32.mrb[28].mxu1 }
 0x1d2   :  { %785 = vmatprep.subr.bf16.mxu0 %v803_v31  ;;  %v419_v12 = vadd.f32 %v697_v11, %v543_v33  ;;  %v413_v13 = vpop.f32.mrb[29].mxu1 }
 0x1d3   :  { %v792_v14 = vpack.c.bf16 %v443_v9, %v442_v10  ;;  %v414_v15 = vadd.f32 %v543_v33, %v413_v13 }
 0x1d4   :  { %v445_v16 = vmax.f32 %v419_v12, 0.0 }
 0x1d5   :  { %v444_v17 = vmax.f32 %v414_v15, 0.0  ;;  %v700_v18 = vpop.f32.mrb[30].mxu1 }
 0x1d6   :  { %v429_v19 = vadd.f32 %v700_v18, %v543_v33  ;;  %v423_v20 = vpop.f32.mrb[31].mxu1 }
 0x1d7   :  { %v795_v21 = vpack.c.bf16 %v445_v16, %v444_v17  ;;  %v424_v22 = vadd.f32 %v543_v33, %v423_v20 }
 0x1d8   :  { %v447_v23 = vmax.f32 %v429_v19, 0.0 }
 0x1d9   :  { %787 = vmatpush3.bf16.xpose.msra.mxu0 %v786_v0  ;;  %v446_v24 = vmax.f32 %v424_v22, 0.0 }
 0x1da   :  { %788 = vmatprep.subr.bf16.mxu0 %v803_v31 }
 0x1db   :  { %v798_v25 = vpack.c.bf16 %v447_v23, %v446_v24 }
 0x1e1   :  { %790 = vmatpush3.bf16.xpose.msra.mxu0 %v789_v7 }
 0x1e2   :  { %791 = vmatprep.subr.bf16.mxu0 %v803_v31 }
 0x1e9   :  { %793 = vmatpush3.bf16.xpose.msra.mxu0 %v792_v14 }
 0x1ea   :  { %794 = vmatprep.subr.bf16.mxu0 %v803_v31 }
 0x1f1   :  { %796 = vmatpush3.bf16.xpose.msra.mxu0 %v795_v21 }
 0x1f2   :  { %797 = vmatprep.subr.bf16.mxu0 %v803_v31 }
 0x1f9   :  { %799 = vmatpush3.bf16.xpose.msra.mxu0 %v798_v25 }
 0x200   :  { %734 = vmatmul.mubr.f32.vlgmr.msra.gmra.mrb[0].mxu0 %v448_v26 }
 0x2d3   :  { %v517_v28 = vpop.f32.mrb[0].mxu0 }
 0x2d4   :  { %v518_v29 = vadd.f32 %v517_v28, %v450_v27  ;;  %v735_v30 = vpop.f32.mrb[1].mxu0 }
 0x2d6   :  { %521 = vst [vmem:[%s1000_s7] sm:$0x1] %v518_v29 }

</bundles_post_ra>
